<compile_context>
chip_gen: v7x
topology: tpu7x:2x2x1
jax: 0.10.0
libtpu: 0.0.40
codegen_flags: <defaults>
</compile_context>

<pallas_src>
import functools

import jax
import jax.numpy as jnp
from jax import lax
from jax.experimental import pallas as pl
from jax.experimental.pallas import tpu as pltpu

_LANE = 128


def _round_up(x, m):
    return ((x + m - 1) // m) * m


def _attention_head_kernel(q_ref, k_ref, v_ref, w_ref, b_ref, o_ref, *,
                           masking: bool, dq_pad: int, dv_pad: int):
    tb, s, e = q_ref.shape
    n = tb * s

    # ---- Fused QKV projection: one MXU push over the row-concatenated streams.
    # The 1/sqrt(Dq) scale is already folded into the Q columns of w/b.
    x = jnp.concatenate(
        [q_ref[...].reshape(n, e),
         k_ref[...].reshape(n, e),
         v_ref[...].reshape(n, e)], axis=0)                      # (3n, E)
    proj = jnp.dot(x, w_ref[...],
                   preferred_element_type=jnp.float32) + b_ref[...]

    # Lane-tile-aligned (multiple-of-128) column slices: no lane shuffling.
    qp = proj[0:n, 0:dq_pad].reshape(tb, s, dq_pad)
    kp = proj[n:2 * n, dq_pad:2 * dq_pad].reshape(tb, s, dq_pad)
    vp = proj[2 * n:3 * n, 2 * dq_pad:2 * dq_pad + dv_pad].reshape(tb, s, dv_pad)

    # ---- Scores: contract last dims directly (no explicit kp transpose).
    # Zero-padded columns of qp/kp contribute exactly 0 to the contraction.
    scores = jnp.einsum('bqd,bkd->bqk', qp, kp,
                        preferred_element_type=jnp.float32)      # (tb, S, S)

    if masking:
        row = lax.broadcasted_iota(jnp.int32, (s, s), 0)
        col = lax.broadcasted_iota(jnp.int32, (s, s), 1)
        # Large-negative additive bias instead of -inf: identical after softmax
        # (exp underflows to exactly 0) and avoids inf-inf NaN hazards.
        neg = jnp.where(col > row, jnp.float32(-1e30), jnp.float32(0.0))
        scores = scores + neg                                    # broadcast over tb

    # ---- Numerically stable softmax; normalization deferred past the PV matmul
    # so the O(S*S) probability tile is never divided.
    m = jnp.max(scores, axis=-1, keepdims=True)
    ex = jnp.exp(scores - m)
    denom = jnp.sum(ex, axis=-1, keepdims=True)

    out = jnp.einsum('bqk,bkd->bqd', ex, vp,
                     preferred_element_type=jnp.float32)         # (tb, S, Dv_pad)
    # approx=True would route to the EUP fast path; exact keeps ~1e-7 accuracy.
    out = out * pl.reciprocal(denom, approx=False)
    o_ref[...] = out.astype(o_ref.dtype)


def attention_head(query, key, value, params, *, masking: bool, batch_block=None):
    """query/key/value: (B, S, E).  params: wq/wk (E,Dq), wv (E,Dv), bq/bk (1,Dq), bv (1,Dv)."""
    B, S, E = query.shape
    Dq = params["wq"].shape[1]
    Dv = params["wv"].shape[1]
    dq_pad = _round_up(Dq, _LANE)
    dv_pad = _round_up(Dv, _LANE)
    n_cols = 2 * dq_pad + dv_pad

    inv_scale = 1.0 / (Dq ** 0.5)

    def pad_cols(a, to):
        a = jnp.asarray(a)
        return a if a.shape[-1] == to else jnp.pad(a, ((0, 0), (0, to - a.shape[-1])))

    # Fused, lane-padded QKV weight/bias; 1/sqrt(Dq) folded into the Q block.
    w_qkv = jnp.concatenate([
        pad_cols(params["wq"] * inv_scale, dq_pad),
        pad_cols(params["wk"], dq_pad),
        pad_cols(params["wv"], dv_pad)], axis=1)                 # (E, n_cols)
    b_qkv = jnp.concatenate([
        pad_cols(jnp.asarray(params["bq"]).reshape(1, Dq) * inv_scale, dq_pad),
        pad_cols(jnp.asarray(params["bk"]).reshape(1, Dq), dq_pad),
        pad_cols(jnp.asarray(params["bv"]).reshape(1, Dv), dv_pad)], axis=1)

    # Batch several sequences per grid step so each step feeds the MXU >= ~256
    # projection rows and amortizes the per-step pipeline overhead.
    if batch_block is None:
        target = max(1, 256 // max(S, 1))
        tb = 1
        for cand in range(1, B + 1):
            if B % cand == 0 and cand <= target:
                tb = cand
    else:
        tb = batch_block
    grid = (B // tb,)

    kernel = functools.partial(_attention_head_kernel, masking=masking,
                               dq_pad=dq_pad, dv_pad=dv_pad)

    out_padded = pl.pallas_call(
        kernel,
        out_shape=jax.ShapeDtypeStruct((B, S, dv_pad), query.dtype),
        grid_spec=pltpu.PrefetchScalarGridSpec(
            num_scalar_prefetch=0,
            grid=grid,
            in_specs=[
                pl.BlockSpec((tb, S, E), lambda b: (b, 0, 0)),    # query
                pl.BlockSpec((tb, S, E), lambda b: (b, 0, 0)),    # key
                pl.BlockSpec((tb, S, E), lambda b: (b, 0, 0)),    # value
                pl.BlockSpec((E, n_cols), lambda b: (0, 0)),      # fused W_qkv
                pl.BlockSpec((1, n_cols), lambda b: (0, 0)),      # fused b_qkv
            ],
            # Lane-dense output block (last dim multiple of 128) -> unmasked stores.
            out_specs=pl.BlockSpec((tb, S, dv_pad), lambda b: (b, 0, 0)),
        ),
        compiler_params=pltpu.CompilerParams(
            dimension_semantics=("parallel",),
            vmem_limit_bytes=48 * 1024 * 1024,
        ),
    )(query, key, value, w_qkv, b_qkv)

    return out_padded[..., :Dv] if dv_pad != Dv else out_padded


def _reference(query, key, value, params, *, masking: bool):
    """Pure-JAX reference mirroring the PyTorch module."""
    qp = query @ params["wq"] + params["bq"]
    kp = key @ params["wk"] + params["bk"]
    vp = value @ params["wv"] + params["bv"]
    scores = jnp.einsum("bqd,bkd->bqk", qp, kp)
    if masking:
        s = scores.shape[-1]
        causal = jnp.triu(jnp.ones((s, s), bool), k=1)
        scores = jnp.where(causal[None], -jnp.inf, scores)
    scores = scores / (qp.shape[-1] ** 0.5)
    attn = jax.nn.softmax(scores, axis=-1)
    return jnp.einsum("bqk,bkd->bqd", attn, vp)


if __name__ == "__main__":
    # Shapes consistent with the module: embedding_dim=32, query_dim=16,
    # value_dim=16, batch=2, seq=8.
    B, S, E, Dq, Dv = 2, 8, 32, 16, 16

    key0 = jax.random.PRNGKey(0)
    ks = jax.random.split(key0, 9)

    query = jax.random.normal(ks[0], (B, S, E), jnp.float32)
    key_x = jax.random.normal(ks[1], (B, S, E), jnp.float32)
    value = jax.random.normal(ks[2], (B, S, E), jnp.float32)

    bound = 1.0 / jnp.sqrt(E)
    params = {
        "wq": jax.random.uniform(ks[3], (E, Dq), jnp.float32, -bound, bound),
        "bq": jax.random.uniform(ks[4], (1, Dq), jnp.float32, -bound, bound),
        "wk": jax.random.uniform(ks[5], (E, Dq), jnp.float32, -bound, bound),
        "bk": jax.random.uniform(ks[6], (1, Dq), jnp.float32, -bound, bound),
        "wv": jax.random.uniform(ks[7], (E, Dv), jnp.float32, -bound, bound),
        "bv": jax.random.uniform(ks[8], (1, Dv), jnp.float32, -bound, bound),
    }

    for masking in (True, False):
        out = attention_head(query, key_x, value, params, masking=masking)
        out = jax.block_until_ready(out)
        ref = _reference(query, key_x, value, params, masking=masking)
        assert out.shape == (B, S, Dv), out.shape
        err = float(jnp.max(jnp.abs(out - ref)))
        assert err < 1e-4, (masking, err)

    print("KERNEL_OK")
</pallas_src>

<mosaic_0001>
module attributes {stable_mosaic.version = 11 : i64} {
  func.func @_attention_head_kernel(%arg0: i32, %arg1: memref<2x8x32xf32, #tpu.memory_space<vmem>>, %arg2: memref<2x8x32xf32, #tpu.memory_space<vmem>>, %arg3: memref<2x8x32xf32, #tpu.memory_space<vmem>>, %arg4: memref<32x384xf32, #tpu.memory_space<vmem>>, %arg5: memref<1x384xf32, #tpu.memory_space<vmem>>, %arg6: memref<2x8x128xf32, #tpu.memory_space<vmem>>) attributes {dimension_semantics = [#tpu.dimension_semantics<parallel>], iteration_bounds = array<i64: 1>, scalar_prefetch = 0 : i64, scratch_operands = 0 : i64, tpu.core_type = #tpu.core_type<tc>, window_params = [{transform_indices = @transform_0, window_bounds = array<i64: 2, 8, 32>}, {transform_indices = @transform_1, window_bounds = array<i64: 2, 8, 32>}, {transform_indices = @transform_2, window_bounds = array<i64: 2, 8, 32>}, {pipeline_mode = #tpu.pipeline_mode<synchronous>, transform_indices = @transform_3, window_bounds = array<i64: 32, 384>}, {pipeline_mode = #tpu.pipeline_mode<synchronous>, transform_indices = @transform_4, window_bounds = array<i64: 1, 384>}, {transform_indices = @transform_5, window_bounds = array<i64: 2, 8, 128>}]} {
    %c0 = arith.constant 0 : index
    %c0_0 = arith.constant 0 : index
    %c0_1 = arith.constant 0 : index
    %0 = vector.load %arg1[%c0, %c0_0, %c0_1] : memref<2x8x32xf32, #tpu.memory_space<vmem>>, vector<2x8x32xf32>
    %1 = vector.shape_cast %0 : vector<2x8x32xf32> to vector<16x32xf32>
    %c0_2 = arith.constant 0 : index
    %c0_3 = arith.constant 0 : index
    %c0_4 = arith.constant 0 : index
    %2 = vector.load %arg2[%c0_2, %c0_3, %c0_4] : memref<2x8x32xf32, #tpu.memory_space<vmem>>, vector<2x8x32xf32>
    %3 = vector.shape_cast %2 : vector<2x8x32xf32> to vector<16x32xf32>
    %c0_5 = arith.constant 0 : index
    %c0_6 = arith.constant 0 : index
    %c0_7 = arith.constant 0 : index
    %4 = vector.load %arg3[%c0_5, %c0_6, %c0_7] : memref<2x8x32xf32, #tpu.memory_space<vmem>>, vector<2x8x32xf32>
    %5 = vector.shape_cast %4 : vector<2x8x32xf32> to vector<16x32xf32>
    %6 = tpu.concatenate %1, %3, %5 in 0 : vector<16x32xf32>, vector<16x32xf32>, vector<16x32xf32> -> vector<48x32xf32>
    %c0_8 = arith.constant 0 : index
    %c0_9 = arith.constant 0 : index
    %7 = vector.load %arg4[%c0_8, %c0_9] : memref<32x384xf32, #tpu.memory_space<vmem>>, vector<32x384xf32>
    %cst = arith.constant dense<0.000000e+00> : vector<48x384xf32>
    %8 = tpu.matmul %6, %7, %cst {dimension_numbers = #tpu.dot_dimension_numbers<[1], [0], [0], [1], [0, 0, 1, 1], [], []>} : vector<48x32xf32>, vector<32x384xf32>, vector<48x384xf32> -> vector<48x384xf32>
    %c0_10 = arith.constant 0 : index
    %c0_11 = arith.constant 0 : index
    %9 = vector.load %arg5[%c0_10, %c0_11] : memref<1x384xf32, #tpu.memory_space<vmem>>, vector<1x384xf32>
    %10 = vector.broadcast %9 : vector<1x384xf32> to vector<48x384xf32>
    %11 = arith.addf %8, %10 : vector<48x384xf32>
    %12 = vector.extract_strided_slice %11 {offsets = [0, 0], sizes = [16, 128], strides = [1, 1]} : vector<48x384xf32> to vector<16x128xf32>
    %13 = vector.shape_cast %12 : vector<16x128xf32> to vector<2x8x128xf32>
    %14 = vector.extract_strided_slice %11 {offsets = [16, 128], sizes = [16, 128], strides = [1, 1]} : vector<48x384xf32> to vector<16x128xf32>
    %15 = vector.shape_cast %14 : vector<16x128xf32> to vector<2x8x128xf32>
    %16 = vector.extract_strided_slice %11 {offsets = [32, 256], sizes = [16, 128], strides = [1, 1]} : vector<48x384xf32> to vector<16x128xf32>
    %17 = vector.shape_cast %16 : vector<16x128xf32> to vector<2x8x128xf32>
    "tpu.trace_start"() <{level = 10 : i32, message = "bqd,bkd->bqk"}> : () -> ()
    %cst_12 = arith.constant dense<0.000000e+00> : vector<2x8x8xf32>
    %18 = tpu.matmul %13, %15, %cst_12 {dimension_numbers = #tpu.dot_dimension_numbers<[2], [2], [1], [1], [0, 0, 0, 1, 1, 1], [0], [0]>} : vector<2x8x128xf32>, vector<2x8x128xf32>, vector<2x8x8xf32> -> vector<2x8x8xf32>
    "tpu.trace_stop"() : () -> ()
    %19 = tpu.iota {dimensions = array<i32: 0>} : vector<8x8xi32>
    %20 = tpu.iota {dimensions = array<i32: 1>} : vector<8x8xi32>
    %21 = arith.cmpi sgt, %20, %19 : vector<8x8xi32>
    %cst_13 = arith.constant -1.000000e+30 : f32
    %cst_14 = arith.constant 0.000000e+00 : f32
    %22 = vector.broadcast %cst_13 : f32 to vector<8x8xf32>
    %23 = vector.broadcast %cst_14 : f32 to vector<8x8xf32>
    %24 = arith.select %21, %22, %23 : vector<8x8xi1>, vector<8x8xf32>
    %25 = vector.shape_cast %24 : vector<8x8xf32> to vector<1x8x8xf32>
    %26 = vector.broadcast %25 : vector<1x8x8xf32> to vector<2x8x8xf32>
    %27 = arith.addf %18, %26 : vector<2x8x8xf32>
    %cst_15 = arith.constant dense<0xFF800000> : vector<2x8xf32>
    %28 = vector.multi_reduction <maximumf>, %27, %cst_15 [2] : vector<2x8x8xf32> to vector<2x8xf32>
    %29 = vector.shape_cast %28 : vector<2x8xf32> to vector<2x8x1xf32>
    %30 = vector.broadcast %29 : vector<2x8x1xf32> to vector<2x8x8xf32>
    %31 = arith.subf %27, %30 : vector<2x8x8xf32>
    %32 = math.exp %31 : vector<2x8x8xf32>
    %cst_16 = arith.constant dense<0.000000e+00> : vector<2x8xf32>
    %33 = vector.multi_reduction <add>, %32, %cst_16 [2] : vector<2x8x8xf32> to vector<2x8xf32>
    %34 = vector.shape_cast %33 : vector<2x8xf32> to vector<2x8x1xf32>
    "tpu.trace_start"() <{level = 10 : i32, message = "bqk,bkd->bqd"}> : () -> ()
    %cst_17 = arith.constant dense<0.000000e+00> : vector<2x8x128xf32>
    %35 = tpu.matmul %32, %17, %cst_17 {dimension_numbers = #tpu.dot_dimension_numbers<[2], [1], [1], [2], [0, 0, 0, 1, 1, 2], [0], [0]>} : vector<2x8x8xf32>, vector<2x8x128xf32>, vector<2x8x128xf32> -> vector<2x8x128xf32>
    "tpu.trace_stop"() : () -> ()
    %36 = tpu.reciprocal %34 : vector<2x8x1xf32> -> vector<2x8x1xf32>
    %37 = vector.broadcast %36 : vector<2x8x1xf32> to vector<2x8x128xf32>
    %38 = arith.mulf %35, %37 : vector<2x8x128xf32>
    %c0_18 = arith.constant 0 : index
    %c0_19 = arith.constant 0 : index
    %c0_20 = arith.constant 0 : index
    %39 = vector.load %arg6[%c0_18, %c0_19, %c0_20] : memref<2x8x128xf32, #tpu.memory_space<vmem>>, vector<2x8x128xf32>
    tpu.vector_store %arg6[%c0_18, %c0_19, %c0_20], %38 {strides = array<i32>} : memref<2x8x128xf32, #tpu.memory_space<vmem>>, vector<2x8x128xf32>,
    return
  }
  func.func @transform_0(%arg0: i32) -> (i32, i32, i32) {
    %c0_i32 = arith.constant 0 : i32
    %c0_i32_0 = arith.constant 0 : i32
    %c0_i32_1 = arith.constant 0 : i32
    return %arg0, %c0_i32, %c0_i32_0 : i32, i32, i32
  }
  func.func @transform_1(%arg0: i32) -> (i32, i32, i32) {
    %c0_i32 = arith.constant 0 : i32
    %c0_i32_0 = arith.constant 0 : i32
    %c0_i32_1 = arith.constant 0 : i32
    return %arg0, %c0_i32, %c0_i32_0 : i32, i32, i32
  }
  func.func @transform_2(%arg0: i32) -> (i32, i32, i32) {
    %c0_i32 = arith.constant 0 : i32
    %c0_i32_0 = arith.constant 0 : i32
    %c0_i32_1 = arith.constant 0 : i32
    return %arg0, %c0_i32, %c0_i32_0 : i32, i32, i32
  }
  func.func @transform_3(%arg0: i32) -> (i32, i32) {
    %c0_i32 = arith.constant 0 : i32
    %c0_i32_0 = arith.constant 0 : i32
    %c0_i32_1 = arith.constant 0 : i32
    return %c0_i32, %c0_i32_0 : i32, i32
  }
  func.func @transform_4(%arg0: i32) -> (i32, i32) {
    %c0_i32 = arith.constant 0 : i32
    %c0_i32_0 = arith.constant 0 : i32
    %c0_i32_1 = arith.constant 0 : i32
    return %c0_i32, %c0_i32_0 : i32, i32
  }
  func.func @transform_5(%arg0: i32) -> (i32, i32, i32) {
    %c0_i32 = arith.constant 0 : i32
    %c0_i32_0 = arith.constant 0 : i32
    %c0_i32_1 = arith.constant 0 : i32
    return %arg0, %c0_i32, %c0_i32_0 : i32, i32, i32
  }
}

</mosaic_0001>

<bundles_post_ra>
// kernel: tpu_custom_call.1
= control target key start
LH: loop header
LB: loop body
LE: loop exit
PB: predicated region body
PF: predicated region fallthrough
CT: control target
= control target key end

     0   :  { %10 = vsyncpa [#allocation3], 0  ;;  %s1039_s0 = inlined_call_operand.hbm [shape: f32[2,8,32], index: 0, kind: input, shape index: {}]   ;;  %s1040_s1 = inlined_call_operand.hbm [shape: f32[2,8,32], index: 1, kind: input, shape index: {}]   ;;  %s1041_s2 = inlined_call_operand.hbm [shape: f32[2,8,32], index: 2, kind: input, shape index: {}]   ;;  %s1042_s3 = inlined_call_operand.hbm [shape: f32[32,384], index: 3, kind: input, shape index: {}]   ;;  %s1043_s4 = inlined_call_operand.vmem [shape: f32[1,384], index: 4, kind: input, shape index: {}]   ;;  %s1044_s5 = inlined_call_operand.hbm [shape: f32[2,8,128], index: 5, kind: output, shape index: {}]  }
   0x1   :  { %11 = vsyncpa [#allocation6], 0 }
   0x2   :  { %12 = vsyncpa [#allocation9], 0 }
   0x3   :  { %13 = vsyncpa [#allocation4], 0  ;;  %s872_s18 = smov [#allocation5]   ;;  %s873_s20 = smov [#allocation2]  }
   0x4   :  { %s31_s19 = sshll.u32 %s872_s18, 4  ;;  %s19_s21 = sshll.u32 %s873_s20, 4  ;;  %s32_s19 = int_to_ptr.vmem [resolvable:$true] %s31_s19  ;;  %s913_s21 = int_to_ptr.vmem [resolvable:$true] %s19_s21 }
   0x5   :  { %s754_s24 = scalar_lea.hbm %s1040_s1, 256 }
   0x6   :  { %p755_p0 = scmp.ne.s32.totalorder %s1040_s1, %s754_s24  ;;  %p758_p1 = scmp.lt.u32.totalorder %s754_s24, %s1040_s1 }
   0x8   :  { %p760_p2 = pnand %p758_p1, %p755_p0 }
   0xa   :  { %763 = shalt.err (!%p760_p2)
}
   0xb   :  { %s764_s29 = scalar_lea.vmem %s32_s19, 256  ;;  %p769_p4 = scmp.lt.s32.totalorder %s32_s19, %s32_s19 }
   0xc   :  { %p765_p3 = scmp.ne.s32.totalorder %s32_s19, %s764_s29  ;;  %p770_p5 = scmp.lt.s32.totalorder %s764_s29, %s764_s29 }
   0xe   :  { %p771_p6 = por %p770_p5, %p769_p4 }
  0x10   :  { %p772_p7 = pnand %p771_p6, %p765_p3 }
  0x12   :  { %775 = shalt.err (!%p772_p7)
}
  0x13   :  { %s874_s30 = smov 128   ;;  %s875_s6 = smov 8  }
  0x14   :  { %37 = dma.hbm_to_vmem [thread:$0]  %s1040_s1, 256, %s32_s19, [#allocation6], %s874_s30, %s874_s30, %s875_s6  }
  0x15   :  { %s776_s11 = scalar_lea.hbm %s1039_s0, 256 }
  0x16   :  { %p777_p8 = scmp.ne.s32.totalorder %s1039_s0, %s776_s11  ;;  %p780_p9 = scmp.lt.u32.totalorder %s776_s11, %s1039_s0 }
  0x18   :  { %p782_p10 = pnand %p780_p9, %p777_p8 }
  0x1a   :  { %785 = shalt.err (!%p782_p10)
}
  0x1b   :  { %s786_s16 = scalar_lea.vmem %s913_s21, 256  ;;  %p791_p12 = scmp.lt.s32.totalorder %s913_s21, %s913_s21 }
  0x1c   :  { %p787_p11 = scmp.ne.s32.totalorder %s913_s21, %s786_s16  ;;  %p792_p13 = scmp.lt.s32.totalorder %s786_s16, %s786_s16 }
  0x1e   :  { %p793_p0 = por %p792_p13, %p791_p12 }
  0x20   :  { %p794_p1 = pnand %p793_p0, %p787_p11 }
  0x22   :  { %797 = shalt.err (!%p794_p1)
}
  0x23   :  { %25 = dma.hbm_to_vmem [thread:$0]  %s1039_s0, 256, %s913_s21, [#allocation3], %s874_s30, %s874_s30, %s875_s6  }
  0x24   :  { %s876_s18 = smov [#allocation7]   ;;  %s877_s20 = smov [#allocation8]  }
  0x25   :  { %s43_s19 = sshll.u32 %s876_s18, 4  ;;  %s55_s22 = sshll.u32 %s877_s20, 4  ;;  %s44_s19 = int_to_ptr.vmem [resolvable:$true] %s43_s19  ;;  %s950_s22 = int_to_ptr.vmem [resolvable:$true] %s55_s22 }
  0x26   :  { %s798_s25 = scalar_lea.hbm %s1041_s2, 256 }
  0x27   :  { %p799_p2 = scmp.ne.s32.totalorder %s1041_s2, %s798_s25  ;;  %p802_p3 = scmp.lt.u32.totalorder %s798_s25, %s1041_s2 }
  0x29   :  { %p804_p4 = pnand %p802_p3, %p799_p2 }
  0x2b   :  { %807 = shalt.err (!%p804_p4)
}
  0x2c   :  { %s808_s0 = scalar_lea.vmem %s44_s19, 256  ;;  %p813_p6 = scmp.lt.s32.totalorder %s44_s19, %s44_s19 }
  0x2d   :  { %p809_p5 = scmp.ne.s32.totalorder %s44_s19, %s808_s0  ;;  %p814_p7 = scmp.lt.s32.totalorder %s808_s0, %s808_s0 }
  0x2f   :  { %p815_p8 = por %p814_p7, %p813_p6 }
  0x31   :  { %p816_p9 = pnand %p815_p8, %p809_p5 }
  0x33   :  { %819 = shalt.err (!%p816_p9)
}
  0x34   :  { %49 = dma.hbm_to_vmem [thread:$0]  %s1041_s2, 256, %s44_s19, [#allocation6], %s874_s30, %s874_s30, %s875_s6  }
  0x35   :  { %s820_s10 = scalar_lea.hbm %s1042_s3, 1536 }
  0x36   :  { %p821_p10 = scmp.ne.s32.totalorder %s1042_s3, %s820_s10  ;;  %p824_p11 = scmp.lt.u32.totalorder %s820_s10, %s1042_s3 }
  0x38   :  { %p826_p12 = pnand %p824_p11, %p821_p10 }
  0x3a   :  { %829 = shalt.err (!%p826_p12)
}
  0x3b   :  { %s830_s15 = scalar_lea.vmem %s950_s22, 1536  ;;  %p835_p0 = scmp.lt.s32.totalorder %s950_s22, %s950_s22 }
  0x3c   :  { %p831_p13 = scmp.ne.s32.totalorder %s950_s22, %s830_s15  ;;  %p836_p1 = scmp.lt.s32.totalorder %s830_s15, %s830_s15 }
  0x3e   :  { %p837_p2 = por %p836_p1, %p835_p0 }
  0x40   :  { %p838_p3 = pnand %p837_p2, %p831_p13 }
  0x42   :  { %841 = shalt.err (!%p838_p3)
}
  0x43   :  { %s878_s2 = smov 384   ;;  %s879_s16 = smov 24  }
  0x44   :  { %61 = dma.hbm_to_vmem [thread:$0]  %s1042_s3, 1536, %s950_s22, [#allocation9], %s878_s2, %s878_s2, %s879_s16  }
  0x45   :  { %864 = dma.done.wait [#allocation3], 256  }
  0x46   :  { %865 = vsyncadd [#allocation3], 4294967040 }
  0x47   :  { %866 = dma.done.wait [#allocation6], 512  }
  0x48   :  { %867 = vsyncadd [#allocation6], 4294966784 }
  0x49   :  { %868 = dma.done.wait [#allocation9], 1536  }
  0x4a   :  { %869 = vsyncadd [#allocation9], 4294965760  ;;  %v880_v0 = vmov 0.0   ;;  %v83_v1 = vld [vmem:[#allocation8 + $0x8] sm:$0xff]  ;;  %v86_v2 = vld [vmem:[#allocation8 + $0x20] sm:$0xff]  ;;  %vm111_vm0 = vcmask 261120   ;;  %v96_v25 = vlaneseq }
  0x4b   :  { %194 = vmatprep.mubr.f32.mxu0 %v880_v0  ;;  %v82_v3 = vld [vmem:[#allocation8] sm:$0xff]  ;;  %v719_v4 = vpack.c.bf16 %v86_v2, %v83_v1  ;;  %v85_v5 = vld [vmem:[#allocation8 + $0x18] sm:$0xff]  ;;  %v92_v7 = vld [vmem:[#allocation8 + $0x50] sm:$0xff]  ;;  %vm881_vm1 = vmmov 0   ;;  %vm460_vm3 = vcmask 64512  }
  0x4c   :  { %v89_v6 = vld [vmem:[#allocation8 + $0x38] sm:$0xff]  ;;  %v721_v8 = vpack.c.bf16 %v85_v5, %v82_v3  ;;  %v88_v10 = vld [vmem:[#allocation8 + $0x30] sm:$0xff]  ;;  %v91_v11 = vld [vmem:[#allocation8 + $0x48] sm:$0xff]  ;;  %v97_v26 = vshrl.u32 %v96_v25, 7  ;;  %v317_v58 = vand.u32 127, %v96_v25 }
  0x4d   :  { %v723_v9 = vpack.c.bf16 %v92_v7, %v89_v6  ;;  %v76_v12 = vld [vmem:[#allocation2] sm:$0xff]  ;;  %720 = vmatprep.subr.bf16.mxu0 %v719_v4  ;;  %v725_v13 = vpack.c.bf16 %v91_v11, %v88_v10  ;;  %v87_v15 = vld [vmem:[#allocation8 + $0x28] sm:$0xff]  ;;  %v90_v16 = vld [vmem:[#allocation8 + $0x40] sm:$0xff] }
  0x4e   :  { %690 = vmatprep.mubr.msk.f32.mxu1 %vm111_vm0, %v76_v12  ;;  %722 = vmatpush1.bf16.msra.mxu0 %v721_v8  ;;  %v84_v14 = vld [vmem:[#allocation8 + $0x10] sm:$0xff]  ;;  %v93_v18 = vld [vmem:[#allocation8 + $0x58] sm:$0xff]  ;;  %v78_v21 = vld [vmem:[#allocation5] sm:$0xff]  ;;  %v102_v29 = vsub.s32 1, %v97_v26  ;;  %v98_v33 = vsub.s32 0, %v97_v26  ;;  %v106_v48 = vsub.s32 2, %v97_v26  ;;  %vm318_vm2 = vcmp.gt.s32.totalorder %v317_v58, %v97_v26 }
  0x4f   :  { %724 = vmatprep.subr.bf16.mxu0 %v723_v9  ;;  %v727_v17 = vpack.c.bf16 %v87_v15, %v84_v14  ;;  %v731_v19 = vpack.c.bf16 %v93_v18, %v90_v16  ;;  %v77_v20 = vld [vmem:[#allocation2 + $0x8] sm:$0xff]  ;;  %v79_v22 = vld [vmem:[#allocation5 + $0x8] sm:$0xff]  ;;  %v80_v23 = vld [vmem:[#allocation7] sm:$0xff]  ;;  %v319_v59 = vsel %vm318_vm2, -1e+30, %v880_v0 }
  0x50   :  { %v81_v24 = vld [vmem:[#allocation7 + $0x8] sm:$0xff]  ;;  %v94_v32 = vld [vmem:[%s1043_s4] sm:$0x7]  ;;  %s882_s4 = smov [#allocation10]  }
  0x51   :  { %728 = vmatprep.subr.bf16.mxu1 %v727_v17  ;;  %v103_v36 = vrot.slane %v94_v32, %v102_v29  ;;  %v99_v39 = vrot.slane %v94_v32, %v98_v33  ;;  %v107_v49 = vrot.slane %v94_v32, %v106_v48  ;;  %s636_s19 = sshll.u32 %s882_s4, 4  ;;  %s637_s19 = int_to_ptr.vmem [resolvable:$true] %s636_s19 }
  0x52   :  { %726 = vmatpush1.bf16.msra.mxu0 %v725_v13  ;;  %730 = vmatpush3.bf16.msra.mxu1 %v727_v17  ;;  %s842_s20 = scalar_lea.vmem %s637_s19, 256  ;;  %p847_p5 = scmp.lt.s32.totalorder %s637_s19, %s637_s19 }
  0x53   :  { %732 = vmatprep.subr.bf16.mxu1 %v731_v19  ;;  %714 = vmatprep.subr.mxu0 %v880_v0  ;;  %p843_p4 = scmp.ne.s32.totalorder %s637_s19, %s842_s20  ;;  %p848_p6 = scmp.lt.s32.totalorder %s842_s20, %s842_s20 }
  0x55   :  { %650 = vmatmul.mubr.msk.f32.vlgmr.msra.gmra.mrb[0].mxu0 %vm111_vm0, %v76_v12  ;;  %p849_p7 = por %p848_p6, %p847_p5 }
  0x56   :  { %199 = vmatprep.mubr.f32.mxu0 %v880_v0  ;;  %734 = vmatpush3.bf16.msra.mxu1 %v731_v19 }
  0x57   :  { %699 = vmatprep.subr.mxu1 %v880_v0  ;;  %p850_p8 = pnand %p849_p7, %p843_p4 }
  0x59   :  { %651 = vmatmul.mubr.msk.f32.gmra.mrb[2].mxu0 %vm111_vm0, %v77_v20  ;;  %691 = vmatmul.mubr.msk.f32.vlgmr.msra.gmra.mrb[0].mxu1 %vm111_vm0, %v77_v20 }
  0x5a   :  { %204 = vmatprep.mubr.f32.mxu0 %v880_v0  ;;  %693 = vmatprep.mubr.msk.f32.mxu1 %vm111_vm0, %v78_v21 }
  0x5d   :  { %652 = vmatmul.mubr.msk.f32.gmra.mrb[4].mxu0 %vm111_vm0, %v78_v21  ;;  %694 = vmatmul.mubr.msk.f32.gmra.mrb[2].mxu1 %vm111_vm0, %v79_v22 }
  0x5e   :  { %209 = vmatprep.mubr.f32.mxu0 %v880_v0  ;;  %696 = vmatprep.mubr.msk.f32.mxu1 %vm111_vm0, %v80_v23 }
  0x61   :  { %653 = vmatmul.mubr.msk.f32.gmra.mrb[6].mxu0 %vm111_vm0, %v79_v22  ;;  %697 = vmatmul.mubr.msk.f32.gmra.mrb[4].mxu1 %vm111_vm0, %v81_v24 }
  0x62   :  { %214 = vmatprep.mubr.f32.mxu0 %v880_v0  ;;  %701 = vmatprep.mubr.msk.f32.mxu1 %vm881_vm1, %v880_v0 }
  0x65   :  { %654 = vmatmul.mubr.msk.f32.gmra.mrb[8].mxu0 %vm111_vm0, %v80_v23 }
  0x66   :  { %218 = vmatprep.mubr.f32.mxu0 %v880_v0 }
  0x69   :  { %655 = vmatmul.mubr.msk.f32.gmra.mrb[10].mxu0 %vm111_vm0, %v81_v24 }
  0x6a   :  { %716 = vmatprep.mubr.msk.f32.mxu0 %vm881_vm1, %v880_v0 }
 0x128   :  { %v196_v27 = vpop.f32.mrb[0].mxu0 }
 0x129   :  { %v198_v28 = vpop.f32.mrb[1].mxu0  ;;  %v197_v44 = vadd.f32 %v196_v27, %v99_v39 }
 0x12c   :  { %v201_v30 = vpop.f32.mrb[2].mxu0  ;;  %v692_v31 = vpop.f32.mrb[0].mxu1 }
 0x12d   :  { %v203_v34 = vpop.f32.mrb[3].mxu0  ;;  %v289_v35 = vpop.f32.mrb[1].mxu1  ;;  %v202_v47 = vadd.f32 %v201_v30, %v99_v39 }
 0x130   :  { %v206_v37 = vpop.f32.mrb[4].mxu0  ;;  %v695_v38 = vpop.f32.mrb[2].mxu1 }
 0x131   :  { %v207_v40 = vpop.f32.mrb[5].mxu0  ;;  %v297_v41 = vpop.f32.mrb[3].mxu1 }
 0x132   :  { %v208_v42 = vadd.f32 %v207_v40, %v103_v36 }
 0x134   :  { %v211_v43 = vpop.f32.mrb[6].mxu0  ;;  %700 = vmatpush3.xpose.msra.mxu1 %v208_v42  ;;  %v698_v51 = vpop.f32.mrb[4].mxu1 }
 0x135   :  { %v212_v45 = vpop.f32.mrb[7].mxu0  ;;  %704 = vmatprep.subr.mxu1 %v880_v0  ;;  %v311_v53 = vadd.f32 %v698_v51, %v107_v49  ;;  %v305_v54 = vpop.f32.mrb[5].mxu1 }
 0x136   :  { %v213_v46 = vadd.f32 %v212_v45, %v103_v36  ;;  %v306_v55 = vadd.f32 %v305_v54, %v107_v49 }
 0x137   :  { %702 = vmatmul.mubr.f32.vlgmr.msra.gmra.mrb[6].mxu1 %v197_v44  ;;  %715 = vmatpush3.msra.mxu0 %v311_v53 }
 0x138   :  { %705 = vmatpush3.xpose.msra.mxu1 %v213_v46  ;;  %706 = vmatprep.mubr.msk.f32.mxu1 %vm881_vm1, %v880_v0  ;;  %v216_v50 = vpop.f32.mrb[8].mxu0 }
 0x139   :  { %709 = vmatprep.subr.mxu1 %v880_v0  ;;  %v217_v52 = vpop.f32.mrb[9].mxu0 }
 0x13b   :  { %707 = vmatmul.mubr.f32.vlgmr.msra.gmra.mrb[8].mxu1 %v202_v47 }
 0x13c   :  { %711 = vmatprep.mubr.msk.f32.mxu1 %vm881_vm1, %v880_v0  ;;  %v220_v56 = vpop.f32.mrb[10].mxu0  ;;  %710 = vmatpush3.msra.mxu1 %v306_v55 }
 0x13d   :  { %v221_v57 = vpop.f32.mrb[11].mxu0 }
 0x20a   :  { %v386_v60 = vpop.f32.mrb[6].mxu1 }
 0x20b   :  { %v387_v61 = vadd.f32 %v386_v60, %v319_v59  ;;  %v703_v62 = vpop.f32.mrb[7].mxu1 }
 0x20d   :  { %v461_v63 = vsel %vm460_vm3, %v387_v61, -inf }
 0x20e   :  { %462 = vmax.xlane.f32.xlu0 %v461_v63  ;;  %v456_v1 = vpop.f32.mrb[8].mxu1 }
 0x20f   :  { %v457_v2 = vadd.f32 %v456_v1, %v319_v59  ;;  %v708_v3 = vpop.f32.mrb[9].mxu1 }
 0x211   :  { %v464_v4 = vsel %vm460_vm3, %v457_v2, -inf }
 0x212   :  { %465 = vmax.xlane.f32.xlu0 %v464_v4 }
 0x29b   :  { %v463_v5 = vpop.xlane.xlu0 %462 }
 0x29c   :  { %v467_v6 = vsub.f32 %v387_v61, %v463_v5 }
 0x29e   :  { %v469_v7 = vmul.f32 1.442695, %v467_v6 }
 0x29f   :  { %v466_v8 = vpop.xlane.xlu0 %465 }
 0x2a0   :  { %746 = vpow2.f32 %v469_v7  ;;  %v468_v9 = vsub.f32 %v457_v2, %v466_v8 }
 0x2a2   :  { %v471_v0 = vmul.f32 1.442695, %v468_v9 }
 0x2a4   :  { %748 = vpow2.f32 %v471_v0 }
 0x2aa   :  { %v747_v10 = vpop.eup %746 }
 0x2ab   :  { %712 = vmatmul.mubr.msk.f32.vlgmr.msra.gmra.mrb[10].mxu1 %vm460_vm3, %v747_v10  ;;  %v473_v11 = vsel %vm460_vm3, %v747_v10, 0.0 }
 0x2ac   :  { %474 = vadd.xlane.f32.xlu1 %v473_v11 }
 0x2ae   :  { %v749_v12 = vpop.eup %748 }
 0x2af   :  { %717 = vmatmul.mubr.msk.f32.vlgmr.msra.gmra.mrb[12].mxu0 %vm460_vm3, %v749_v12  ;;  %v476_v13 = vsel %vm460_vm3, %v749_v12, 0.0 }
 0x2b0   :  { %477 = vadd.xlane.f32.xlu1 %v476_v13 }
 0x339   :  { %v475_v14 = vpop.xlane.xlu1 %474 }
 0x33a   :  { %750 = vrcp.f32 %v475_v14 }
 0x33d   :  { %v478_v15 = vpop.xlane.xlu1 %477 }
 0x33e   :  { %752 = vrcp.f32 %v478_v15 }
 0x344   :  { %v751_v16 = vpop.eup %750 }
 0x348   :  { %v753_v20 = vpop.eup %752 }
 0x37e   :  { %v548_v17 = vpop.f32.mrb[10].mxu1 }
 0x37f   :  { %v627_v18 = vmul.f32 %v751_v16, %v548_v17  ;;  %v713_v19 = vpop.f32.mrb[11].mxu1 }
 0x381   :  { %629 = vst [vmem:[#allocation10] sm:$0xff] %v627_v18 }
 0x382   :  { %v621_v21 = vpop.f32.mrb[12].mxu0 }
 0x383   :  { %v628_v22 = vmul.f32 %v753_v20, %v621_v21  ;;  %v718_v23 = vpop.f32.mrb[13].mxu0 }
 0x385   :  { %630 = vst [vmem:[#allocation10 + $0x8] sm:$0xff] %v628_v22 }
 0x386   :  { %853 = shalt.err (!%p850_p8)
}
 0x387   :  { %s854_s24 = scalar_lea.hbm %s1044_s5, 256 }
 0x388   :  { %p855_p9 = scmp.ne.s32.totalorder %s1044_s5, %s854_s24  ;;  %p858_p10 = scmp.lt.u32.totalorder %s854_s24, %s1044_s5 }
 0x38a   :  { %p860_p11 = pnand %p858_p10, %p855_p9 }
 0x38c   :  { %863 = shalt.err (!%p860_p11)
}
 0x38d   :  { %642 = dma.vmem_to_hbm [thread:$0]  %s637_s19, 256, %s1044_s5, [#allocation4], %s874_s30, %s874_s30, %s875_s6  }
 0x38e   :  { %870 = dma.done.wait [#allocation4], 256  }
 0x38f   :  { %871 = vsyncadd [#allocation4], 4294967040 }
 0x390   :  { %646 = vsyncpa [#allocation3], 1 }
 0x391   :  { %647 = vsyncpa [#allocation6], 1 }
 0x392   :  { %648 = vsyncpa [#allocation9], 1 }
 0x393   :  { %649 = vsyncpa [#allocation4], 1 }

</bundles_post_ra>
